<compile_context>
chip_gen: v5e
topology: v5e:2x2
jax: 0.10.0
libtpu: 0.0.40
codegen_flags: <defaults>
</compile_context>

<pallas_src>
import math

import jax
import jax.numpy as jnp
from jax.experimental import pallas as pl
from jax.experimental.pallas import tpu as pltpu

D_MODEL = 256
D_FF = 512
DROP_P = 0.1  # unused at inference

FF_CHUNK = 256  # d_ff chunk width processed per inner step (multiple of 128)


def _round_up(x, m):
    return ((x + m - 1) // m) * m


def _pick_tm(M):
    """Row-tile selection: big enough to amortize the ~0.35us per-step pipeline
    overhead, small enough to keep >= 2 grid steps for dual-TensorCore chips
    when M is large."""
    if M <= 256:
        return max(8, _round_up(M, 8))
    half = _round_up(-(-M // 2), 256)   # ceil(M/2) rounded up to 256
    return min(512, half)


def ffn_kernel(x_ref, w1_ref, b1_ref, w2_ref, b2_ref, o_ref):
    # x_ref: (tm, d_model) bf16, w1: (d_model, d_ff) bf16, b1: (1, d_ff) f32
    # w2: (d_ff, d_model) bf16, b2: (1, d_model) f32, o: (tm, d_model)
    x = x_ref[...]
    d_ff = w1_ref.shape[1]
    chunk = FF_CHUNK if d_ff % FF_CHUNK == 0 else d_ff
    n_chunks = d_ff // chunk

    acc = None
    # Static (trace-time, fully unrolled) loop over d_ff chunks: produce a
    # slice of the hidden layer and immediately fold it into the second
    # matmul's accumulator.
    for c in range(n_chunks):
        lo = c * chunk
        hi = lo + chunk
        h = jnp.dot(x, w1_ref[:, lo:hi], preferred_element_type=jnp.float32)
        h = jnp.maximum(h + b1_ref[:, lo:hi], 0.0)          # bias + ReLU in f32
        # Dropout: identity in eval mode.
        part = jnp.dot(h.astype(w2_ref.dtype), w2_ref[lo:hi, :],
                       preferred_element_type=jnp.float32)
        acc = part if acc is None else acc + part
    o_ref[...] = (acc + b2_ref[...]).astype(o_ref.dtype)


def feed_forward(x, w1, b1, w2, b2):
    """x: (..., d_model) -> (..., d_model)"""
    orig_shape = x.shape
    d_model = orig_shape[-1]
    d_ff = w1.shape[1]
    x2 = x.reshape(-1, d_model)
    M = x2.shape[0]

    tm = _pick_tm(M)
    M_pad = _round_up(M, tm)
    if M_pad != M:
        x2 = jnp.pad(x2, ((0, M_pad - M), (0, 0)))
    grid_m = M_pad // tm

    # bf16 MXU inputs; accumulation stays f32 inside the kernel.
    xb = x2.astype(jnp.bfloat16)
    w1b = w1.astype(jnp.bfloat16)
    w2b = w2.astype(jnp.bfloat16)
    b1_2d = b1.reshape(1, d_ff).astype(jnp.float32)
    b2_2d = b2.reshape(1, d_model).astype(jnp.float32)

    out_dtype = x.dtype
    flops = 4 * M_pad * d_model * d_ff  # two matmuls, 2 flops per MAC
    bytes_accessed = (
        xb.size * 2 + w1b.size * 2 + w2b.size * 2            # bf16 inputs
        + b1_2d.size * 4 + b2_2d.size * 4                     # f32 biases
        + M_pad * d_model * jnp.dtype(out_dtype).itemsize     # output
    )

    out = pl.pallas_call(
        ffn_kernel,
        out_shape=jax.ShapeDtypeStruct((M_pad, d_model), out_dtype),
        grid_spec=pltpu.PrefetchScalarGridSpec(
            num_scalar_prefetch=0,
            grid=(grid_m,),
            in_specs=[
                pl.BlockSpec((tm, d_model), lambda i: (i, 0)),
                # Weights/biases are grid-invariant (constant index_map) ->
                # fetched into VMEM once and reused across all row tiles.
                pl.BlockSpec((d_model, d_ff), lambda i: (0, 0)),
                pl.BlockSpec((1, d_ff), lambda i: (0, 0)),
                pl.BlockSpec((d_ff, d_model), lambda i: (0, 0)),
                pl.BlockSpec((1, d_model), lambda i: (0, 0)),
            ],
            out_specs=pl.BlockSpec((tm, d_model), lambda i: (i, 0)),
        ),
        compiler_params=pltpu.CompilerParams(
            dimension_semantics=("parallel",)),
        cost_estimate=pl.CostEstimate(
            flops=flops, transcendentals=0, bytes_accessed=bytes_accessed),
    )(xb, w1b, b1_2d, w2b, b2_2d)

    out = out[:M]
    return out.reshape(orig_shape)


def init_params(key, d_model, d_ff):
    """Deterministic init mimicking PyTorch nn.Linear default (uniform +/- 1/sqrt(fan_in))."""
    k1, k2, k3, k4 = jax.random.split(key, 4)
    lim1 = 1.0 / math.sqrt(d_model)
    lim2 = 1.0 / math.sqrt(d_ff)
    w1 = jax.random.uniform(k1, (d_model, d_ff), jnp.float32, -lim1, lim1)
    b1 = jax.random.uniform(k2, (d_ff,), jnp.float32, -lim1, lim1)
    w2 = jax.random.uniform(k3, (d_ff, d_model), jnp.float32, -lim2, lim2)
    b2 = jax.random.uniform(k4, (d_model,), jnp.float32, -lim2, lim2)
    return w1, b1, w2, b2


if __name__ == "__main__":
    key = jax.random.PRNGKey(0)
    kx, kp = jax.random.split(key)

    batch, seq = 2, 8
    x = jax.random.normal(kx, (batch, seq, D_MODEL), jnp.float32)
    w1, b1, w2, b2 = init_params(kp, D_MODEL, D_FF)

    y = feed_forward(x, w1, b1, w2, b2)
    y = jax.block_until_ready(y)

    # Reference mirroring the kernel's bf16-input / f32-accumulate math.
    xb = x.astype(jnp.bfloat16).astype(jnp.float32)
    w1b = w1.astype(jnp.bfloat16).astype(jnp.float32)
    w2b = w2.astype(jnp.bfloat16).astype(jnp.float32)
    h = jnp.maximum(xb @ w1b + b1, 0.0)
    ref = h.astype(jnp.bfloat16).astype(jnp.float32) @ w2b + b2

    assert y.shape == x.shape
    assert jnp.allclose(y, ref, atol=2e-2, rtol=2e-2)

    print("KERNEL_OK")
</pallas_src>

<mosaic_0001>
module attributes {stable_mosaic.version = 11 : i64} {
  func.func @ffn_kernel(%arg0: i32, %arg1: memref<16x256xbf16, #tpu.memory_space<vmem>>, %arg2: memref<256x512xbf16, #tpu.memory_space<vmem>>, %arg3: memref<1x512xf32, #tpu.memory_space<vmem>>, %arg4: memref<512x256xbf16, #tpu.memory_space<vmem>>, %arg5: memref<1x256xf32, #tpu.memory_space<vmem>>, %arg6: memref<16x256xf32, #tpu.memory_space<vmem>>) attributes {dimension_semantics = [#tpu.dimension_semantics<parallel>], iteration_bounds = array<i64: 1>, scalar_prefetch = 0 : i64, scratch_operands = 0 : i64, tpu.core_type = #tpu.core_type<tc>, window_params = [{transform_indices = @transform_0, window_bounds = array<i64: 16, 256>}, {pipeline_mode = #tpu.pipeline_mode<synchronous>, transform_indices = @transform_1, window_bounds = array<i64: 256, 512>}, {pipeline_mode = #tpu.pipeline_mode<synchronous>, transform_indices = @transform_2, window_bounds = array<i64: 1, 512>}, {pipeline_mode = #tpu.pipeline_mode<synchronous>, transform_indices = @transform_3, window_bounds = array<i64: 512, 256>}, {pipeline_mode = #tpu.pipeline_mode<synchronous>, transform_indices = @transform_4, window_bounds = array<i64: 1, 256>}, {transform_indices = @transform_5, window_bounds = array<i64: 16, 256>}]} {
    %c0 = arith.constant 0 : index
    %c0_0 = arith.constant 0 : index
    %0 = vector.load %arg1[%c0, %c0_0] : memref<16x256xbf16, #tpu.memory_space<vmem>>, vector<16x256xbf16>
    %c0_1 = arith.constant 0 : index
    %c0_2 = arith.constant 0 : index
    %1 = vector.load %arg2[%c0_1, %c0_2] : memref<256x512xbf16, #tpu.memory_space<vmem>>, vector<256x256xbf16>
    %cst = arith.constant dense<0.000000e+00> : vector<16x256xf32>
    %2 = tpu.matmul %0, %1, %cst {dimension_numbers = #tpu.dot_dimension_numbers<[1], [0], [0], [1], [0, 0, 1, 1], [], []>} : vector<16x256xbf16>, vector<256x256xbf16>, vector<16x256xf32> -> vector<16x256xf32>
    %c0_3 = arith.constant 0 : index
    %c0_4 = arith.constant 0 : index
    %3 = vector.load %arg3[%c0_3, %c0_4] : memref<1x512xf32, #tpu.memory_space<vmem>>, vector<1x256xf32>
    %4 = vector.broadcast %3 : vector<1x256xf32> to vector<16x256xf32>
    %5 = arith.addf %2, %4 : vector<16x256xf32>
    %cst_5 = arith.constant 0.000000e+00 : f32
    %6 = vector.broadcast %cst_5 : f32 to vector<16x256xf32>
    %7 = arith.maximumf %5, %6 : vector<16x256xf32>
    %8 = arith.truncf %7 : vector<16x256xf32> to vector<16x256xbf16>
    %c0_6 = arith.constant 0 : index
    %c0_7 = arith.constant 0 : index
    %9 = vector.load %arg4[%c0_6, %c0_7] : memref<512x256xbf16, #tpu.memory_space<vmem>>, vector<256x256xbf16>
    %cst_8 = arith.constant dense<0.000000e+00> : vector<16x256xf32>
    %10 = tpu.matmul %8, %9, %cst_8 {dimension_numbers = #tpu.dot_dimension_numbers<[1], [0], [0], [1], [0, 0, 1, 1], [], []>} : vector<16x256xbf16>, vector<256x256xbf16>, vector<16x256xf32> -> vector<16x256xf32>
    %c0_9 = arith.constant 0 : index
    %c256 = arith.constant 256 : index
    %11 = vector.load %arg2[%c0_9, %c256] : memref<256x512xbf16, #tpu.memory_space<vmem>>, vector<256x256xbf16>
    %cst_10 = arith.constant dense<0.000000e+00> : vector<16x256xf32>
    %12 = tpu.matmul %0, %11, %cst_10 {dimension_numbers = #tpu.dot_dimension_numbers<[1], [0], [0], [1], [0, 0, 1, 1], [], []>} : vector<16x256xbf16>, vector<256x256xbf16>, vector<16x256xf32> -> vector<16x256xf32>
    %c0_11 = arith.constant 0 : index
    %c256_12 = arith.constant 256 : index
    %13 = vector.load %arg3[%c0_11, %c256_12] : memref<1x512xf32, #tpu.memory_space<vmem>>, vector<1x256xf32>
    %14 = vector.broadcast %13 : vector<1x256xf32> to vector<16x256xf32>
    %15 = arith.addf %12, %14 : vector<16x256xf32>
    %cst_13 = arith.constant 0.000000e+00 : f32
    %16 = vector.broadcast %cst_13 : f32 to vector<16x256xf32>
    %17 = arith.maximumf %15, %16 : vector<16x256xf32>
    %18 = arith.truncf %17 : vector<16x256xf32> to vector<16x256xbf16>
    %c256_14 = arith.constant 256 : index
    %c0_15 = arith.constant 0 : index
    %19 = vector.load %arg4[%c256_14, %c0_15] : memref<512x256xbf16, #tpu.memory_space<vmem>>, vector<256x256xbf16>
    %cst_16 = arith.constant dense<0.000000e+00> : vector<16x256xf32>
    %20 = tpu.matmul %18, %19, %cst_16 {dimension_numbers = #tpu.dot_dimension_numbers<[1], [0], [0], [1], [0, 0, 1, 1], [], []>} : vector<16x256xbf16>, vector<256x256xbf16>, vector<16x256xf32> -> vector<16x256xf32>
    %21 = arith.addf %10, %20 : vector<16x256xf32>
    %c0_17 = arith.constant 0 : index
    %c0_18 = arith.constant 0 : index
    %22 = vector.load %arg5[%c0_17, %c0_18] : memref<1x256xf32, #tpu.memory_space<vmem>>, vector<1x256xf32>
    %23 = vector.broadcast %22 : vector<1x256xf32> to vector<16x256xf32>
    %24 = arith.addf %21, %23 : vector<16x256xf32>
    %c0_19 = arith.constant 0 : index
    %c0_20 = arith.constant 0 : index
    %25 = vector.load %arg6[%c0_19, %c0_20] : memref<16x256xf32, #tpu.memory_space<vmem>>, vector<16x256xf32>
    tpu.vector_store %arg6[%c0_19, %c0_20], %24 {strides = array<i32>} : memref<16x256xf32, #tpu.memory_space<vmem>>, vector<16x256xf32>,
    return
  }
  func.func @transform_0(%arg0: i32) -> (i32, i32) {
    %c0_i32 = arith.constant 0 : i32
    %c0_i32_0 = arith.constant 0 : i32
    return %arg0, %c0_i32 : i32, i32
  }
  func.func @transform_1(%arg0: i32) -> (i32, i32) {
    %c0_i32 = arith.constant 0 : i32
    %c0_i32_0 = arith.constant 0 : i32
    %c0_i32_1 = arith.constant 0 : i32
    return %c0_i32, %c0_i32_0 : i32, i32
  }
  func.func @transform_2(%arg0: i32) -> (i32, i32) {
    %c0_i32 = arith.constant 0 : i32
    %c0_i32_0 = arith.constant 0 : i32
    %c0_i32_1 = arith.constant 0 : i32
    return %c0_i32, %c0_i32_0 : i32, i32
  }
  func.func @transform_3(%arg0: i32) -> (i32, i32) {
    %c0_i32 = arith.constant 0 : i32
    %c0_i32_0 = arith.constant 0 : i32
    %c0_i32_1 = arith.constant 0 : i32
    return %c0_i32, %c0_i32_0 : i32, i32
  }
  func.func @transform_4(%arg0: i32) -> (i32, i32) {
    %c0_i32 = arith.constant 0 : i32
    %c0_i32_0 = arith.constant 0 : i32
    %c0_i32_1 = arith.constant 0 : i32
    return %c0_i32, %c0_i32_0 : i32, i32
  }
  func.func @transform_5(%arg0: i32) -> (i32, i32) {
    %c0_i32 = arith.constant 0 : i32
    %c0_i32_0 = arith.constant 0 : i32
    return %arg0, %c0_i32 : i32, i32
  }
}

</mosaic_0001>

<bundles_post_ra>
// kernel: tpu_custom_call.1
= control target key start
LH: loop header
LB: loop body
LE: loop exit
PB: predicated region body
PF: predicated region fallthrough
CT: control target
= control target key end

     0   :  { %10 = vsyncpa [#allocation3], 0  ;;  %s2025_s0 = inlined_call_operand.hbm [shape: bf16[16,256], index: 0, kind: input, shape index: {}]   ;;  %s2026_s1 = inlined_call_operand.hbm [shape: bf16[256,512], index: 1, kind: input, shape index: {}]   ;;  %s2027_s2 = inlined_call_operand.hbm [shape: f32[1,512], index: 2, kind: input, shape index: {}]   ;;  %s2028_s3 = inlined_call_operand.hbm [shape: bf16[512,256], index: 3, kind: input, shape index: {}]   ;;  %s2029_s4 = inlined_call_operand.vmem [shape: f32[1,256], index: 4, kind: input, shape index: {}]   ;;  %s2030_s5 = inlined_call_operand.hbm [shape: f32[16,256], index: 5, kind: output, shape index: {}]  }
   0x1   :  { %11 = vsyncpa [#allocation6], 0 }
   0x2   :  { %12 = vsyncpa [#allocation9], 0  ;;  %s31_s20 = sshll.u32 %s2026_s1, 4  ;;  %s32_s20 = int_to_ptr.hbm [resolvable:$true] %s31_s20 }
   0x3   :  { %13 = vsyncpa [#allocation4], 0  ;;  %s1932_s21 = smov [#allocation5]   ;;  %s18_s25 = sshll.u32 %s2025_s0, 4  ;;  %s19_s25 = int_to_ptr.hbm [resolvable:$true] %s18_s25 }
   0x4   :  { %s33_s22 = sshll.u32 %s1932_s21, 4  ;;  %s1933_s26 = smov 256   ;;  %s34_s22 = int_to_ptr.vmem [resolvable:$true] %s33_s22 }
   0x5   :  { %s1934_s27 = smov 16   ;;  %s1935_s28 = smov [#allocation2]  }
   0x6   :  { %39 = dma.hbm_to_vmem [thread:$0]  %s32_s20, 8192, %s34_s22, [#allocation6], %s1933_s26, %s1933_s26, %s1934_s27  }
   0x7   :  { %s20_s29 = sshll.u32 %s1935_s28, 4  ;;  %s1936_s1 = smov 128   ;;  %s21_s29 = int_to_ptr.vmem [resolvable:$true] %s20_s29 }
   0x8   :  { %s1937_s30 = smov 8   ;;  %s45_s8 = sshll.u32 %s2027_s2, 4  ;;  %s46_s8 = int_to_ptr.hbm [resolvable:$true] %s45_s8 }
   0x9   :  { %26 = dma.hbm_to_vmem [thread:$0]  %s19_s25, 256, %s21_s29, [#allocation3], %s1936_s1, %s1936_s1, %s1937_s30  }
   0xa   :  { %s1938_s9 = smov [#allocation7]   ;;  %s55_s12 = sshll.u32 %s2028_s3, 4  ;;  %s56_s12 = int_to_ptr.hbm [resolvable:$true] %s55_s12 }
   0xb   :  { %s47_s0 = sshll.u32 %s1938_s9, 4  ;;  %s1939_s13 = smov [#allocation8]   ;;  %s48_s0 = int_to_ptr.vmem [resolvable:$true] %s47_s0 }
   0xc   :  { %50 = dma.hbm_to_vmem [thread:$0]  %s46_s8, 64, %s48_s0, [#allocation6]  }
   0xd   :  { %s57_s14 = sshll.u32 %s1939_s13, 4  ;;  %s58_s14 = int_to_ptr.vmem [resolvable:$true] %s57_s14 }
   0xe   :  { %63 = dma.hbm_to_vmem [thread:$0]  %s56_s12, 8192, %s58_s14, [#allocation9], %s1936_s1, %s1936_s1, %s1937_s30  }
   0xf   :  { %1924 = dma.done.wait [#allocation3], 256  }
  0x10   :  { %1925 = vsyncadd [#allocation3], 4294967040 }
  0x11   :  { %1926 = dma.done.wait [#allocation6], 8256  }
  0x12   :  { %1927 = vsyncadd [#allocation6], 4294959040 }
  0x13   :  { %1928 = dma.done.wait [#allocation9], 8192  }
  0x14   :  { %1929 = vsyncadd [#allocation9], 4294959104  ;;  %v1211_v0 = vld [vmem:[#allocation5 + $0xe0] sm:$0xf]  ;;  %v1682_v1 = vld [vmem:[#allocation5 + $0xec] sm:$0xf0] }
  0x15   :  { %v1275_v2 = vld [vmem:[#allocation5 + $0x1e0] sm:$0xf]  ;;  %v1212_v3 = vor.u32 %v1682_v1, %v1211_v0  ;;  %v1698_v4 = vld [vmem:[#allocation5 + $0x1ec] sm:$0xf0]  ;;  %v1681_v5 = vld [vmem:[#allocation5 + $0xe4] sm:$0xf] }
  0x16   :  { %v1213_v6 = vld [vmem:[#allocation5 + $0xf0] sm:$0xf0]  ;;  %v1276_v7 = vor.u32 %v1698_v4, %v1275_v2  ;;  %v1697_v9 = vld [vmem:[#allocation5 + $0x1e4] sm:$0xf]  ;;  %v1203_v11 = vld [vmem:[#allocation5 + $0xc0] sm:$0xf] }
  0x17   :  { %v1216_v8 = vor.u32 %v1681_v5, %v1213_v6  ;;  %v1277_v10 = vld [vmem:[#allocation5 + $0x1f0] sm:$0xf0]  ;;  %292 = vmatpush.bf16.msra.mxu0 %v1212_v3  ;;  %v1680_v13 = vld [vmem:[#allocation5 + $0xcc] sm:$0xf0]  ;;  %v1267_v14 = vld [vmem:[#allocation5 + $0x1c0] sm:$0xf] }
  0x18   :  { %v1280_v12 = vor.u32 %v1697_v9, %v1277_v10  ;;  %v1696_v15 = vld [vmem:[#allocation5 + $0x1cc] sm:$0xf0]  ;;  %306 = vmatpush.bf16.msra.mxu1 %v1276_v7  ;;  %v1204_v16 = vor.u32 %v1680_v13, %v1203_v11  ;;  %v1679_v18 = vld [vmem:[#allocation5 + $0xc4] sm:$0xf]  ;;  %v1205_v19 = vld [vmem:[#allocation5 + $0xd0] sm:$0xf0] }
  0x19   :  { %320 = vmatpush.bf16.msra.mxu2 %v1216_v8  ;;  %v1268_v17 = vor.u32 %v1696_v15, %v1267_v14  ;;  %v1695_v20 = vld [vmem:[#allocation5 + $0x1c4] sm:$0xf]  ;;  %v1208_v21 = vor.u32 %v1679_v18, %v1205_v19  ;;  %v1269_v22 = vld [vmem:[#allocation5 + $0x1d0] sm:$0xf0]  ;;  %v1195_v23 = vld [vmem:[#allocation5 + $0xa0] sm:$0xf] }
  0x1a   :  { %334 = vmatpush.bf16.msra.mxu3 %v1280_v12  ;;  %v1678_v24 = vld [vmem:[#allocation5 + $0xac] sm:$0xf0]  ;;  %v1272_v25 = vor.u32 %v1695_v20, %v1269_v22  ;;  %v1259_v26 = vld [vmem:[#allocation5 + $0x1a0] sm:$0xf]  ;;  %v1677_v28 = vld [vmem:[#allocation5 + $0xa4] sm:$0xf] }
  0x1b   :  { %v1694_v27 = vld [vmem:[#allocation5 + $0x1ac] sm:$0xf0]  ;;  %293 = vmatpush.bf16.msra.mxu0 %v1204_v16  ;;  %v1196_v29 = vor.u32 %v1678_v24, %v1195_v23  ;;  %v1197_v30 = vld [vmem:[#allocation5 + $0xb0] sm:$0xf0]  ;;  %v1693_v31 = vld [vmem:[#allocation5 + $0x1a4] sm:$0xf] }
  0x1c   :  { %v1261_v32 = vld [vmem:[#allocation5 + $0x1b0] sm:$0xf0]  ;;  %307 = vmatpush.bf16.msra.mxu1 %v1268_v17  ;;  %v1260_v33 = vor.u32 %v1694_v27, %v1259_v26  ;;  %v1200_v34 = vor.u32 %v1677_v28, %v1197_v30  ;;  %v1187_v35 = vld [vmem:[#allocation5 + $0x80] sm:$0xf]  ;;  %v1676_v36 = vld [vmem:[#allocation5 + $0x8c] sm:$0xf0] }
  0x1d   :  { %321 = vmatpush.bf16.msra.mxu2 %v1208_v21  ;;  %v1251_v37 = vld [vmem:[#allocation5 + $0x180] sm:$0xf]  ;;  %v1264_v38 = vor.u32 %v1693_v31, %v1261_v32  ;;  %v1692_v39 = vld [vmem:[#allocation5 + $0x18c] sm:$0xf0]  ;;  %v1675_v40 = vld [vmem:[#allocation5 + $0x84] sm:$0xf]  ;;  %v1188_v44 = vor.u32 %v1676_v36, %v1187_v35 }
  0x1e   :  { %335 = vmatpush.bf16.msra.mxu3 %v1272_v25  ;;  %v1189_v41 = vld [vmem:[#allocation5 + $0x90] sm:$0xf0]  ;;  %v1691_v42 = vld [vmem:[#allocation5 + $0x184] sm:$0xf]  ;;  %v1252_v45 = vor.u32 %v1692_v39, %v1251_v37  ;;  %v1179_v47 = vld [vmem:[#allocation5 + $0x60] sm:$0xf] }
  0x1f   :  { %v1253_v43 = vld [vmem:[#allocation5 + $0x190] sm:$0xf0]  ;;  %294 = vmatpush.bf16.msra.mxu0 %v1196_v29  ;;  %v1192_v46 = vor.u32 %v1675_v40, %v1189_v41  ;;  %v1674_v48 = vld [vmem:[#allocation5 + $0x6c] sm:$0xf0]  ;;  %v1243_v49 = vld [vmem:[#allocation5 + $0x160] sm:$0xf] }
  0x20   :  { %308 = vmatpush.bf16.msra.mxu1 %v1260_v33  ;;  %v1256_v50 = vor.u32 %v1691_v42, %v1253_v43  ;;  %v1690_v51 = vld [vmem:[#allocation5 + $0x16c] sm:$0xf0]  ;;  %v1673_v52 = vld [vmem:[#allocation5 + $0x64] sm:$0xf]  ;;  %v1181_v53 = vld [vmem:[#allocation5 + $0x70] sm:$0xf0]  ;;  %v1180_v56 = vor.u32 %v1674_v48, %v1179_v47 }
  0x21   :  { %322 = vmatpush.bf16.msra.mxu2 %v1200_v34  ;;  %v1689_v54 = vld [vmem:[#allocation5 + $0x164] sm:$0xf]  ;;  %v1245_v55 = vld [vmem:[#allocation5 + $0x170] sm:$0xf0]  ;;  %v1244_v57 = vor.u32 %v1690_v51, %v1243_v49  ;;  %v1184_v58 = vor.u32 %v1673_v52, %v1181_v53  ;;  %v1171_v59 = vld [vmem:[#allocation5 + $0x40] sm:$0xf] }
  0x22   :  { %336 = vmatpush.bf16.msra.mxu3 %v1264_v38  ;;  %v1672_v60 = vld [vmem:[#allocation5 + $0x4c] sm:$0xf0]  ;;  %v1235_v61 = vld [vmem:[#allocation5 + $0x140] sm:$0xf]  ;;  %v1248_v62 = vor.u32 %v1689_v54, %v1245_v55  ;;  %v1671_v0 = vld [vmem:[#allocation5 + $0x44] sm:$0xf] }
  0x23   :  { %295 = vmatpush.bf16.msra.mxu0 %v1188_v44  ;;  %v1688_v63 = vld [vmem:[#allocation5 + $0x14c] sm:$0xf0]  ;;  %v1173_v1 = vld [vmem:[#allocation5 + $0x50] sm:$0xf0]  ;;  %v1687_v2 = vld [vmem:[#allocation5 + $0x144] sm:$0xf]  ;;  %v1172_v4 = vor.u32 %v1672_v60, %v1171_v59 }
  0x24   :  { %309 = vmatpush.bf16.msra.mxu1 %v1252_v45  ;;  %v1237_v3 = vld [vmem:[#allocation5 + $0x150] sm:$0xf0]  ;;  %v1236_v5 = vor.u32 %v1688_v63, %v1235_v61  ;;  %v1176_v6 = vor.u32 %v1671_v0, %v1173_v1  ;;  %v1163_v7 = vld [vmem:[#allocation5 + $0x20] sm:$0xf]  ;;  %v1670_v8 = vld [vmem:[#allocation5 + $0x2c] sm:$0xf0] }
  0x25   :  { %323 = vmatpush.bf16.msra.mxu2 %v1192_v46  ;;  %v1227_v9 = vld [vmem:[#allocation5 + $0x120] sm:$0xf]  ;;  %v1240_v10 = vor.u32 %v1687_v2, %v1237_v3  ;;  %v1686_v11 = vld [vmem:[#allocation5 + $0x12c] sm:$0xf0]  ;;  %v1669_v12 = vld [vmem:[#allocation5 + $0x24] sm:$0xf]  ;;  %v1164_v16 = vor.u32 %v1670_v8, %v1163_v7 }
  0x26   :  { %337 = vmatpush.bf16.msra.mxu3 %v1256_v50  ;;  %v1165_v13 = vld [vmem:[#allocation5 + $0x30] sm:$0xf0]  ;;  %v1685_v14 = vld [vmem:[#allocation5 + $0x124] sm:$0xf]  ;;  %v1155_v17 = vld [vmem:[#allocation5] sm:$0xf]  ;;  %v1228_v20 = vor.u32 %v1686_v11, %v1227_v9 }
  0x27   :  { %296 = vmatpush.bf16.msra.mxu0 %v1180_v56  ;;  %v1229_v15 = vld [vmem:[#allocation5 + $0x130] sm:$0xf0]  ;;  %v1668_v18 = vld [vmem:[#allocation5 + $0xc] sm:$0xf0]  ;;  %v1219_v19 = vld [vmem:[#allocation5 + $0x100] sm:$0xf]  ;;  %v1168_v21 = vor.u32 %v1669_v12, %v1165_v13 }
  0x28   :  { %310 = vmatpush.bf16.msra.mxu1 %v1244_v57  ;;  %v1684_v22 = vld [vmem:[#allocation5 + $0x10c] sm:$0xf0]  ;;  %v1667_v23 = vld [vmem:[#allocation5 + $0x4] sm:$0xf]  ;;  %v1157_v24 = vld [vmem:[#allocation5 + $0x10] sm:$0xf0]  ;;  %v1232_v25 = vor.u32 %v1685_v14, %v1229_v15  ;;  %v1156_v32 = vor.u32 %v1668_v18, %v1155_v17 }
  0x29   :  { %324 = vmatpush.bf16.msra.mxu2 %v1184_v58  ;;  %v1683_v26 = vld [vmem:[#allocation5 + $0x104] sm:$0xf]  ;;  %v1221_v27 = vld [vmem:[#allocation5 + $0x110] sm:$0xf0]  ;;  %v1339_v28 = vld [vmem:[#allocation5 + $0xe8] sm:$0xf]  ;;  %v1220_v36 = vor.u32 %v1684_v22, %v1219_v19  ;;  %v1160_v37 = vor.u32 %v1667_v23, %v1157_v24 }
  0x2a   :  { %338 = vmatpush.bf16.msra.mxu3 %v1248_v62  ;;  %v1746_v29 = vld [vmem:[#allocation5 + $0xf4] sm:$0xf0]  ;;  %v1403_v30 = vld [vmem:[#allocation5 + $0x1e8] sm:$0xf]  ;;  %v1745_v33 = vld [vmem:[#allocation5 + $0xec] sm:$0xf]  ;;  %v1224_v41 = vor.u32 %v1683_v26, %v1221_v27 }
  0x2b   :  { %297 = vmatpush.bf16.msra.mxu0 %v1172_v4  ;;  %v1762_v31 = vld [vmem:[#allocation5 + $0x1f4] sm:$0xf0]  ;;  %v1341_v34 = vld [vmem:[#allocation5 + $0xf8] sm:$0xf0]  ;;  %v1761_v35 = vld [vmem:[#allocation5 + $0x1ec] sm:$0xf]  ;;  %v1340_v42 = vor.u32 %v1746_v29, %v1339_v28 }
  0x2c   :  { %311 = vmatpush.bf16.msra.mxu1 %v1236_v5  ;;  %v1405_v38 = vld [vmem:[#allocation5 + $0x1f8] sm:$0xf0]  ;;  %v1147_v39 = vld [vmem:[#allocation2] sm:$0xf]  ;;  %v1666_v40 = vld [vmem:[#allocation2 + $0x4] sm:$0xf0]  ;;  %v1404_v45 = vor.u32 %v1762_v31, %v1403_v30  ;;  %v1344_v46 = vor.u32 %v1745_v33, %v1341_v34 }
  0x2d   :  { %325 = vmatpush.bf16.msra.mxu2 %v1176_v6  ;;  %v1331_v43 = vld [vmem:[#allocation5 + $0xc8] sm:$0xf]  ;;  %v1744_v44 = vld [vmem:[#allocation5 + $0xd4] sm:$0xf0]  ;;  %v1665_v48 = vld [vmem:[#allocation2 + $0x4] sm:$0xf]  ;;  %v1408_v50 = vor.u32 %v1761_v35, %v1405_v38  ;;  %v1986_v54 = vor.u32 %v1666_v40, %v1147_v39 }
  0x2e   :  { %339 = vmatpush.bf16.msra.mxu3 %v1240_v10  ;;  %v1395_v47 = vld [vmem:[#allocation5 + $0x1c8] sm:$0xf]  ;;  %v1149_v49 = vld [vmem:[#allocation2 + $0x8] sm:$0xf0]  ;;  %v1760_v51 = vld [vmem:[#allocation5 + $0x1d4] sm:$0xf0]  ;;  %v1332_v58 = vor.u32 %v1744_v44, %v1331_v43 }
  0x2f   :  { %298 = vmatpush.bf16.msra.mxu0 %v1164_v16  ;;  %v1743_v52 = vld [vmem:[#allocation5 + $0xcc] sm:$0xf]  ;;  %v1333_v53 = vld [vmem:[#allocation5 + $0xd8] sm:$0xf0]  ;;  %v1988_v57 = vor.u32 %v1665_v48, %v1149_v49  ;;  %v1396_v59 = vor.u32 %v1760_v51, %v1395_v47  ;;  %v1323_v61 = vld [vmem:[#allocation5 + $0xa8] sm:$0xf] }
  0x30   :  { %312 = vmatpush.bf16.msra.mxu1 %v1228_v20  ;;  %v1759_v55 = vld [vmem:[#allocation5 + $0x1cc] sm:$0xf]  ;;  %v1397_v56 = vld [vmem:[#allocation5 + $0x1d8] sm:$0xf0]  ;;  %v1336_v60 = vor.u32 %v1743_v52, %v1333_v53  ;;  %v1742_v62 = vld [vmem:[#allocation5 + $0xb4] sm:$0xf0] }
  0x31   :  { %326 = vmatpush.bf16.msra.mxu2 %v1168_v21  ;;  %v1387_v63 = vld [vmem:[#allocation5 + $0x1a8] sm:$0xf]  ;;  %v1400_v0 = vor.u32 %v1759_v55, %v1397_v56  ;;  %v1758_v1 = vld [vmem:[#allocation5 + $0x1b4] sm:$0xf0]  ;;  %v1741_v2 = vld [vmem:[#allocation5 + $0xac] sm:$0xf]  ;;  %v1324_v6 = vor.u32 %v1742_v62, %v1323_v61 }
  0x32   :  { %340 = vmatpush.bf16.msra.mxu3 %v1232_v25  ;;  %v1325_v3 = vld [vmem:[#allocation5 + $0xb8] sm:$0xf0]  ;;  %v1757_v4 = vld [vmem:[#allocation5 + $0x1ac] sm:$0xf]  ;;  %v1388_v7 = vor.u32 %v1758_v1, %v1387_v63  ;;  %v1315_v9 = vld [vmem:[#allocation5 + $0x88] sm:$0xf] }
  0x33   :  { %299 = vmatpush.bf16.msra.mxu0 %v1156_v32  ;;  %v1389_v5 = vld [vmem:[#allocation5 + $0x1b8] sm:$0xf0]  ;;  %v1328_v8 = vor.u32 %v1741_v2, %v1325_v3  ;;  %v1740_v10 = vld [vmem:[#allocation5 + $0x94] sm:$0xf0]  ;;  %v1379_v11 = vld [vmem:[#allocation5 + $0x188] sm:$0xf] }
  0x34   :  { %313 = vmatpush.bf16.msra.mxu1 %v1220_v36  ;;  %v1392_v12 = vor.u32 %v1757_v4, %v1389_v5  ;;  %v1756_v13 = vld [vmem:[#allocation5 + $0x194] sm:$0xf0]  ;;  %v1739_v14 = vld [vmem:[#allocation5 + $0x8c] sm:$0xf]  ;;  %v1317_v15 = vld [vmem:[#allocation5 + $0x98] sm:$0xf0]  ;;  %v1316_v18 = vor.u32 %v1740_v10, %v1315_v9 }
  0x35   :  { %327 = vmatpush.bf16.msra.mxu2 %v1160_v37  ;;  %v1755_v16 = vld [vmem:[#allocation5 + $0x18c] sm:$0xf]  ;;  %v1381_v17 = vld [vmem:[#allocation5 + $0x198] sm:$0xf0]  ;;  %v1380_v19 = vor.u32 %v1756_v13, %v1379_v11  ;;  %v1320_v20 = vor.u32 %v1739_v14, %v1317_v15  ;;  %v1307_v21 = vld [vmem:[#allocation5 + $0x68] sm:$0xf] }
  0x36   :  { %341 = vmatpush.bf16.msra.mxu3 %v1224_v41  ;;  %300 = vmatmul.bf16.vlgmr.msra.gmra.mxu0 %v1986_v54  ;;  %v1738_v22 = vld [vmem:[#allocation5 + $0x74] sm:$0xf0]  ;;  %v1371_v23 = vld [vmem:[#allocation5 + $0x168] sm:$0xf]  ;;  %v1384_v24 = vor.u32 %v1755_v16, %v1381_v17  ;;  %v1737_v26 = vld [vmem:[#allocation5 + $0x6c] sm:$0xf] }
  0x37   :  { %584 = vmatpush.bf16.msrb.mxu0 %v1340_v42  ;;  %314 = vmatmul.bf16.vlgmr.msra.gmra.mxu1 %v1988_v57  ;;  %v1754_v25 = vld [vmem:[#allocation5 + $0x174] sm:$0xf0]  ;;  %v1309_v27 = vld [vmem:[#allocation5 + $0x78] sm:$0xf0]  ;;  %v1753_v28 = vld [vmem:[#allocation5 + $0x16c] sm:$0xf]  ;;  %v1308_v30 = vor.u32 %v1738_v22, %v1307_v21 }
  0x38   :  { %598 = vmatpush.bf16.msrb.mxu1 %v1404_v45  ;;  %328 = vmatmul.bf16.vlgmr.msra.gmra.mxu2 %v1986_v54  ;;  %v1373_v29 = vld [vmem:[#allocation5 + $0x178] sm:$0xf0]  ;;  %v1372_v31 = vor.u32 %v1754_v25, %v1371_v23  ;;  %v1312_v32 = vor.u32 %v1737_v26, %v1309_v27  ;;  %v1299_v33 = vld [vmem:[#allocation5 + $0x48] sm:$0xf]  ;;  %v1736_v34 = vld [vmem:[#allocation5 + $0x54] sm:$0xf0] }
  0x39   :  { %612 = vmatpush.bf16.msrb.mxu2 %v1344_v46  ;;  %342 = vmatmul.bf16.vlgmr.msra.gmra.mxu3 %v1988_v57  ;;  %v1363_v35 = vld [vmem:[#allocation5 + $0x148] sm:$0xf]  ;;  %v1376_v36 = vor.u32 %v1753_v28, %v1373_v29  ;;  %v1752_v37 = vld [vmem:[#allocation5 + $0x154] sm:$0xf0]  ;;  %v1735_v38 = vld [vmem:[#allocation5 + $0x4c] sm:$0xf]  ;;  %v1300_v42 = vor.u32 %v1736_v34, %v1299_v33 }
  0x3a   :  { %626 = vmatpush.bf16.msrb.mxu3 %v1408_v50  ;;  %v1301_v39 = vld [vmem:[#allocation5 + $0x58] sm:$0xf0]  ;;  %v1751_v40 = vld [vmem:[#allocation5 + $0x14c] sm:$0xf]  ;;  %v1364_v43 = vor.u32 %v1752_v37, %v1363_v35  ;;  %v1291_v45 = vld [vmem:[#allocation5 + $0x28] sm:$0xf] }
  0x3b   :  { %585 = vmatpush.bf16.msrb.mxu0 %v1332_v58  ;;  %v1365_v41 = vld [vmem:[#allocation5 + $0x158] sm:$0xf0]  ;;  %v1304_v44 = vor.u32 %v1735_v38, %v1301_v39  ;;  %v1734_v46 = vld [vmem:[#allocation5 + $0x34] sm:$0xf0]  ;;  %v1355_v47 = vld [vmem:[#allocation5 + $0x128] sm:$0xf] }
  0x3c   :  { %599 = vmatpush.bf16.msrb.mxu1 %v1396_v59  ;;  %v1368_v48 = vor.u32 %v1751_v40, %v1365_v41  ;;  %v1750_v49 = vld [vmem:[#allocation5 + $0x134] sm:$0xf0]  ;;  %v1733_v50 = vld [vmem:[#allocation5 + $0x2c] sm:$0xf]  ;;  %v1293_v51 = vld [vmem:[#allocation5 + $0x38] sm:$0xf0]  ;;  %v1292_v55 = vor.u32 %v1734_v46, %v1291_v45 }
  0x3d   :  { %613 = vmatpush.bf16.msrb.mxu2 %v1336_v60  ;;  %v1749_v52 = vld [vmem:[#allocation5 + $0x12c] sm:$0xf]  ;;  %v1357_v53 = vld [vmem:[#allocation5 + $0x138] sm:$0xf0]  ;;  %v1283_v56 = vld [vmem:[#allocation5 + $0x8] sm:$0xf]  ;;  %v1356_v58 = vor.u32 %v1750_v49, %v1355_v47  ;;  %v1296_v59 = vor.u32 %v1733_v50, %v1293_v51 }
  0x3e   :  { %627 = vmatpush.bf16.msrb.mxu3 %v1400_v0  ;;  %v1732_v60 = vld [vmem:[#allocation5 + $0x14] sm:$0xf0]  ;;  %v1347_v61 = vld [vmem:[#allocation5 + $0x108] sm:$0xf]  ;;  %v1360_v63 = vor.u32 %v1749_v52, %v1357_v53  ;;  %v1731_v0 = vld [vmem:[#allocation5 + $0xc] sm:$0xf] }
  0x3f   :  { %586 = vmatpush.bf16.msrb.mxu0 %v1324_v6  ;;  %v1748_v62 = vld [vmem:[#allocation5 + $0x114] sm:$0xf0]  ;;  %v1285_v1 = vld [vmem:[#allocation5 + $0x18] sm:$0xf0]  ;;  %v1747_v2 = vld [vmem:[#allocation5 + $0x10c] sm:$0xf]  ;;  %v1284_v6 = vor.u32 %v1732_v60, %v1283_v56 }
  0x40   :  { %600 = vmatpush.bf16.msrb.mxu1 %v1388_v7  ;;  %v1349_v3 = vld [vmem:[#allocation5 + $0x118] sm:$0xf0]  ;;  %v1467_v4 = vld [vmem:[#allocation8 + $0x170] sm:$0xf]  ;;  %v1777_v7 = vld [vmem:[#allocation8 + $0x174] sm:$0xf]  ;;  %v1348_v9 = vor.u32 %v1748_v62, %v1347_v61  ;;  %v1288_v10 = vor.u32 %v1731_v0, %v1285_v1 }
  0x41   :  { %614 = vmatpush.bf16.msrb.mxu2 %v1328_v8  ;;  %v1778_v5 = vld [vmem:[#allocation8 + $0x174] sm:$0xf0]  ;;  %v1469_v8 = vld [vmem:[#allocation8 + $0x178] sm:$0xf0]  ;;  %v1352_v11 = vor.u32 %v1747_v2, %v1349_v3  ;;  %v1459_v13 = vld [vmem:[#allocation8 + $0x160] sm:$0xf] }
  0x42   :  { %628 = vmatpush.bf16.msrb.mxu3 %v1392_v12  ;;  %v1468_v12 = vor.u32 %v1778_v5, %v1467_v4  ;;  %v1531_v14 = vld [vmem:[#allocation8 + $0x1f0] sm:$0xf]  ;;  %v1794_v15 = vld [vmem:[#allocation8 + $0x1f4] sm:$0xf0]  ;;  %v1472_v16 = vor.u32 %v1777_v7, %v1469_v8  ;;  %v1776_v17 = vld [vmem:[#allocation8 + $0x164] sm:$0xf0] }
  0x43   :  { %587 = vmatpush.bf16.msrb.mxu0 %v1316_v18  ;;  %v1793_v18 = vld [vmem:[#allocation8 + $0x1f4] sm:$0xf]  ;;  %v1461_v21 = vld [vmem:[#allocation8 + $0x168] sm:$0xf0]  ;;  %v1532_v22 = vor.u32 %v1794_v15, %v1531_v14  ;;  %v1460_v23 = vor.u32 %v1776_v17, %v1459_v13  ;;  %v1451_v26 = vld [vmem:[#allocation8 + $0x150] sm:$0xf] }
  0x44   :  { %601 = vmatpush.bf16.msrb.mxu1 %v1380_v19  ;;  %v1533_v19 = vld [vmem:[#allocation8 + $0x1f8] sm:$0xf0]  ;;  %v1774_v27 = vld [vmem:[#allocation8 + $0x154] sm:$0xf0]  ;;  %v1773_v28 = vld [vmem:[#allocation8 + $0x154] sm:$0xf] }
  0x45   :  { %615 = vmatpush.bf16.msrb.mxu2 %v1320_v20  ;;  %v1775_v20 = vld [vmem:[#allocation8 + $0x164] sm:$0xf]  ;;  %v1452_v29 = vor.u32 %v1774_v27, %v1451_v26  ;;  %v1792_v33 = vld [vmem:[#allocation8 + $0x1e4] sm:$0xf0]  ;;  %v1445_v40 = vld [vmem:[#allocation8 + $0x148] sm:$0xf0] }
  0x46   :  { %629 = vmatpush.bf16.msrb.mxu3 %v1384_v24  ;;  %v1536_v24 = vor.u32 %v1793_v18, %v1533_v19  ;;  %v1464_v25 = vor.u32 %v1775_v20, %v1461_v21  ;;  %v1791_v34 = vld [vmem:[#allocation8 + $0x1e4] sm:$0xf]  ;;  %v1772_v37 = vld [vmem:[#allocation8 + $0x144] sm:$0xf0]  ;;  %v1515_v41 = vld [vmem:[#allocation8 + $0x1d0] sm:$0xf] }
  0x47   :  { %588 = vmatpush.bf16.msrb.mxu0 %v1308_v30  ;;  %v1453_v30 = vld [vmem:[#allocation8 + $0x158] sm:$0xf0]  ;;  %v1771_v38 = vld [vmem:[#allocation8 + $0x144] sm:$0xf]  ;;  %v1789_v45 = vld [vmem:[#allocation8 + $0x1d4] sm:$0xf] }
  0x48   :  { %602 = vmatpush.bf16.msrb.mxu1 %v1372_v31  ;;  %v1456_v31 = vor.u32 %v1773_v28, %v1453_v30  ;;  %v1517_v46 = vld [vmem:[#allocation8 + $0x1d8] sm:$0xf0]  ;;  %v1435_v47 = vld [vmem:[#allocation8 + $0x130] sm:$0xf]  ;;  %v1770_v49 = vld [vmem:[#allocation8 + $0x134] sm:$0xf0] }
  0x49   :  { %616 = vmatpush.bf16.msrb.mxu2 %v1312_v32  ;;  %v1523_v32 = vld [vmem:[#allocation8 + $0x1e0] sm:$0xf]  ;;  %v1769_v50 = vld [vmem:[#allocation8 + $0x134] sm:$0xf]  ;;  %v1437_v51 = vld [vmem:[#allocation8 + $0x138] sm:$0xf0]  ;;  %v1436_v52 = vor.u32 %v1770_v49, %v1435_v47 }
  0x4a   :  { %630 = vmatpush.bf16.msrb.mxu3 %v1376_v36  ;;  %v1524_v35 = vor.u32 %v1792_v33, %v1523_v32  ;;  %v1525_v36 = vld [vmem:[#allocation8 + $0x1e8] sm:$0xf0]  ;;  %v1440_v53 = vor.u32 %v1769_v50, %v1437_v51  ;;  %v1788_v56 = vld [vmem:[#allocation8 + $0x1c4] sm:$0xf0]  ;;  %v1427_v62 = vld [vmem:[#allocation8 + $0x120] sm:$0xf] }
  0x4b   :  { %589 = vmatpush.bf16.msrb.mxu0 %v1300_v42  ;;  %v1790_v42 = vld [vmem:[#allocation8 + $0x1d4] sm:$0xf0]  ;;  %v1509_v60 = vld [vmem:[#allocation8 + $0x1c8] sm:$0xf0]  ;;  %v1767_v0 = vld [vmem:[#allocation8 + $0x124] sm:$0xf] }
  0x4c   :  { %603 = vmatpush.bf16.msrb.mxu1 %v1364_v43  ;;  %v1448_v43 = vor.u32 %v1771_v38, %v1445_v40  ;;  %v1429_v2 = vld [vmem:[#allocation8 + $0x128] sm:$0xf0]  ;;  %v1499_v3 = vld [vmem:[#allocation8 + $0x1b0] sm:$0xf]  ;;  %v1786_v4 = vld [vmem:[#allocation8 + $0x1b4] sm:$0xf0] }
  0x4d   :  { %617 = vmatpush.bf16.msrb.mxu2 %v1304_v44  ;;  %v1516_v44 = vor.u32 %v1790_v42, %v1515_v41  ;;  %v1432_v5 = vor.u32 %v1767_v0, %v1429_v2  ;;  %v1785_v7 = vld [vmem:[#allocation8 + $0x1b4] sm:$0xf]  ;;  %v1501_v8 = vld [vmem:[#allocation8 + $0x1b8] sm:$0xf0]  ;;  %v1784_v17 = vld [vmem:[#allocation8 + $0x1a4] sm:$0xf0] }
  0x4e   :  { %631 = vmatpush.bf16.msrb.mxu3 %v1368_v48  ;;  %v1520_v48 = vor.u32 %v1789_v45, %v1517_v46  ;;  %v1421_v13 = vld [vmem:[#allocation8 + $0x118] sm:$0xf0]  ;;  %v1783_v18 = vld [vmem:[#allocation8 + $0x1a4] sm:$0xf]  ;;  %v1493_v20 = vld [vmem:[#allocation8 + $0x1a8] sm:$0xf0] }
  0x4f   :  { %590 = vmatpush.bf16.msrb.mxu0 %v1292_v55  ;;  %v1507_v55 = vld [vmem:[#allocation8 + $0x1c0] sm:$0xf]  ;;  %v1496_v21 = vor.u32 %v1783_v18, %v1493_v20  ;;  %v1413_v26 = vld [vmem:[#allocation8 + $0x108] sm:$0xf0]  ;;  %v1595_v27 = vld [vmem:[#allocation8 + $0x70] sm:$0xf] }
  0x50   :  { %604 = vmatpush.bf16.msrb.mxu1 %v1356_v58  ;;  %v1787_v58 = vld [vmem:[#allocation8 + $0x1c4] sm:$0xf]  ;;  %v1714_v28 = vld [vmem:[#allocation8 + $0x74] sm:$0xf0]  ;;  %v1597_v32 = vld [vmem:[#allocation8 + $0x78] sm:$0xf0] }
  0x51   :  { %618 = vmatpush.bf16.msrb.mxu2 %v1296_v59  ;;  %v1508_v59 = vor.u32 %v1788_v56, %v1507_v55  ;;  %v1512_v61 = vor.u32 %v1787_v58, %v1509_v60  ;;  %v1596_v30 = vor.u32 %v1714_v28, %v1595_v27  ;;  %v1483_v33 = vld [vmem:[#allocation8 + $0x190] sm:$0xf]  ;;  %v1587_v38 = vld [vmem:[#allocation8 + $0x60] sm:$0xf]  ;;  %v1711_v41 = vld [vmem:[#allocation8 + $0x64] sm:$0xf] }
  0x52   :  { %632 = vmatpush.bf16.msrb.mxu3 %v1360_v63  ;;  %v1768_v63 = vld [vmem:[#allocation8 + $0x124] sm:$0xf0]  ;;  %v1589_v42 = vld [vmem:[#allocation8 + $0x68] sm:$0xf0]  ;;  %v1779_v46 = vld [vmem:[#allocation8 + $0x184] sm:$0xf] }
  0x53   :  { %591 = vmatpush.bf16.msrb.mxu0 %v1284_v6  ;;  %v1428_v1 = vor.u32 %v1768_v63, %v1427_v62  ;;  %v1500_v6 = vor.u32 %v1786_v4, %v1499_v3  ;;  %v1780_v45 = vld [vmem:[#allocation8 + $0x184] sm:$0xf0]  ;;  %v1477_v47 = vld [vmem:[#allocation8 + $0x188] sm:$0xf0]  ;;  %v1659_v50 = vld [vmem:[#allocation8 + $0xf0] sm:$0xf] }
  0x54   :  { %605 = vmatpush.bf16.msrb.mxu1 %v1348_v9  ;;  %v1419_v9 = vld [vmem:[#allocation8 + $0x110] sm:$0xf]  ;;  %v1480_v49 = vor.u32 %v1779_v46, %v1477_v47  ;;  %v1730_v51 = vld [vmem:[#allocation8 + $0xf4] sm:$0xf0]  ;;  %v1661_v55 = vld [vmem:[#allocation8 + $0xf8] sm:$0xf0] }
  0x55   :  { %619 = vmatpush.bf16.msrb.mxu2 %v1288_v10  ;;  %v1504_v10 = vor.u32 %v1785_v7, %v1501_v8  ;;  %v1579_v56 = vld [vmem:[#allocation8 + $0x50] sm:$0xf]  ;;  %v1709_v60 = vld [vmem:[#allocation8 + $0x54] sm:$0xf]  ;;  %v1651_v0 = vld [vmem:[#allocation8 + $0xe0] sm:$0xf] }
  0x56   :  { %633 = vmatpush.bf16.msrb.mxu3 %v1352_v11  ;;  %592 = vmatmul.bf16.vlgmr.msrb.gmra.mxu0 %v1986_v54  ;;  %v1766_v11 = vld [vmem:[#allocation8 + $0x114] sm:$0xf0]  ;;  %v1727_v2 = vld [vmem:[#allocation8 + $0xe4] sm:$0xf]  ;;  %v1653_v4 = vld [vmem:[#allocation8 + $0xe8] sm:$0xf0] }
  0x57   :  { %838 = vmatpush.bf16.msra.mxu0 %v1468_v12  ;;  %606 = vmatmul.bf16.vlgmr.msrb.gmra.mxu1 %v1988_v57  ;;  %v1765_v12 = vld [vmem:[#allocation8 + $0x114] sm:$0xf]  ;;  %v1420_v14 = vor.u32 %v1766_v11, %v1419_v9  ;;  %v1708_v7 = vld [vmem:[#allocation8 + $0x44] sm:$0xf0]  ;;  %v1707_v8 = vld [vmem:[#allocation8 + $0x44] sm:$0xf] }
  0x58   :  { %620 = vmatmul.bf16.vlgmr.msrb.gmra.mxu2 %v1986_v54  ;;  %852 = vmatpush.bf16.msra.mxu1 %v1532_v22  ;;  %v1528_v54 = vor.u32 %v1791_v34, %v1525_v36  ;;  %v1424_v15 = vor.u32 %v1765_v12, %v1421_v13  ;;  %v1411_v22 = vld [vmem:[#allocation8 + $0x100] sm:$0xf]  ;;  %v1781_v36 = vld [vmem:[#allocation8 + $0x194] sm:$0xf]  ;;  %v1573_v11 = vld [vmem:[#allocation8 + $0x48] sm:$0xf0] }
  0x59   :  { %866 = vmatpush.bf16.msra.mxu2 %v1472_v16  ;;  %634 = vmatmul.bf16.vlgmr.msrb.gmra.mxu3 %v1988_v57  ;;  %v1443_v57 = vld [vmem:[#allocation8 + $0x140] sm:$0xf]  ;;  %v1576_v13 = vor.u32 %v1707_v8, %v1573_v11  ;;  %v1645_v18 = vld [vmem:[#allocation8 + $0xd8] sm:$0xf0]  ;;  %v1563_v20 = vld [vmem:[#allocation8 + $0x30] sm:$0xf] }
  0x5a   :  { %880 = vmatpush.bf16.msra.mxu3 %v1536_v24  ;;  %v1444_v39 = vor.u32 %v1772_v37, %v1443_v57  ;;  %v1491_v16 = vld [vmem:[#allocation8 + $0x1a0] sm:$0xf]  ;;  %v1763_v24 = vld [vmem:[#allocation8 + $0x104] sm:$0xf]  ;;  %v1724_v27 = vld [vmem:[#allocation8 + $0xc4] sm:$0xf0] }
  0x5b   :  { %839 = vmatpush.bf16.msra.mxu0 %v1460_v23  ;;  %v1492_v19 = vor.u32 %v1784_v17, %v1491_v16  ;;  %v1764_v23 = vld [vmem:[#allocation8 + $0x104] sm:$0xf0]  ;;  %v1725_v16 = vld [vmem:[#allocation8 + $0xd4] sm:$0xf]  ;;  %v1723_v28 = vld [vmem:[#allocation8 + $0xc4] sm:$0xf] }
  0x5c   :  { %853 = vmatpush.bf16.msra.mxu1 %v1524_v35  ;;  %v1782_v35 = vld [vmem:[#allocation8 + $0x194] sm:$0xf0]  ;;  %s1130_s18 = sshll.u32 %s2030_s5, 4  ;;  %s1131_s18 = int_to_ptr.hbm [resolvable:$true] %s1130_s18 }
  0x5d   :  { %867 = vmatpush.bf16.msra.mxu2 %v1464_v25  ;;  %v1412_v25 = vor.u32 %v1764_v23, %v1411_v22  ;;  %v1484_v57 = vor.u32 %v1782_v35, %v1483_v33  ;;  %v1705_v23 = vld [vmem:[#allocation8 + $0x34] sm:$0xf]  ;;  %v1555_v33 = vld [vmem:[#allocation8 + $0x20] sm:$0xf]  ;;  %v1703_v35 = vld [vmem:[#allocation8 + $0x24] sm:$0xf] }
  0x5e   :  { %881 = vmatpush.bf16.msra.mxu3 %v1528_v54  ;;  %v1485_v54 = vld [vmem:[#allocation8 + $0x198] sm:$0xf0] }
  0x5f   :  { %840 = vmatpush.bf16.msra.mxu0 %v1452_v29  ;;  %v1416_v29 = vor.u32 %v1763_v24, %v1413_v26  ;;  %v1488_v37 = vor.u32 %v1781_v36, %v1485_v54  ;;  %v1565_v24 = vld [vmem:[#allocation8 + $0x38] sm:$0xf0]  ;;  %v1635_v26 = vld [vmem:[#allocation8 + $0xc0] sm:$0xf] }
  0x60   :  { %854 = vmatpush.bf16.msra.mxu1 %v1516_v44  ;;  %v1592_v44 = vor.u32 %v1711_v41, %v1589_v42 }
  0x61   :  { %868 = vmatpush.bf16.msra.mxu2 %v1456_v31  ;;  %v1713_v31 = vld [vmem:[#allocation8 + $0x74] sm:$0xf] }
  0x62   :  { %882 = vmatpush.bf16.msra.mxu3 %v1520_v48  ;;  %v1600_v34 = vor.u32 %v1713_v31, %v1597_v32 }
  0x63   :  { %841 = vmatpush.bf16.msra.mxu0 %v1444_v39  ;;  %v1712_v39 = vld [vmem:[#allocation8 + $0x64] sm:$0xf0] }
  0x64   :  { %855 = vmatpush.bf16.msra.mxu1 %v1508_v59  ;;  %v1588_v40 = vor.u32 %v1712_v39, %v1587_v38  ;;  %v1710_v59 = vld [vmem:[#allocation8 + $0x54] sm:$0xf0]  ;;  %v1627_v38 = vld [vmem:[#allocation8 + $0xb0] sm:$0xf] }
  0x65   :  { %869 = vmatpush.bf16.msra.mxu2 %v1448_v43  ;;  %v1475_v43 = vld [vmem:[#allocation8 + $0x180] sm:$0xf]  ;;  %v1580_v62 = vor.u32 %v1710_v59, %v1579_v56  ;;  %v1722_v39 = vld [vmem:[#allocation8 + $0xb4] sm:$0xf0]  ;;  %v1621_v56 = vld [vmem:[#allocation8 + $0xa8] sm:$0xf0] }
  0x66   :  { %883 = vmatpush.bf16.msra.mxu3 %v1512_v61  ;;  %v1476_v48 = vor.u32 %v1780_v45, %v1475_v43  ;;  %v1581_v61 = vld [vmem:[#allocation8 + $0x58] sm:$0xf0]  ;;  %v1628_v42 = vor.u32 %v1722_v39, %v1627_v38  ;;  %v1702_v45 = vld [vmem:[#allocation8 + $0x14] sm:$0xf0]  ;;  %v1539_v59 = vld [vmem:[#allocation8] sm:$0xf] }
  0x67   :  { %842 = vmatpush.bf16.msra.mxu0 %v1436_v52  ;;  %v1729_v52 = vld [vmem:[#allocation8 + $0xf4] sm:$0xf]  ;;  %v1584_v63 = vor.u32 %v1709_v60, %v1581_v61  ;;  %v1629_v43 = vld [vmem:[#allocation8 + $0xb8] sm:$0xf0]  ;;  %v1700_v60 = vld [vmem:[#allocation8 + $0x4] sm:$0xf0] }
  0x68   :  { %856 = vmatpush.bf16.msra.mxu1 %v1500_v6  ;;  %v1664_v58 = vor.u32 %v1729_v52, %v1661_v55  ;;  %v1571_v6 = vld [vmem:[#allocation8 + $0x40] sm:$0xf]  ;;  %v1719_v55 = vld [vmem:[#allocation8 + $0xa4] sm:$0xf] }
  0x69   :  { %870 = vmatpush.bf16.msra.mxu2 %v1440_v53  ;;  %v1660_v53 = vor.u32 %v1730_v51, %v1659_v50  ;;  %v1549_v50 = vld [vmem:[#allocation8 + $0x18] sm:$0xf0]  ;;  %v1619_v51 = vld [vmem:[#allocation8 + $0xa0] sm:$0xf]  ;;  %v1699_v61 = vld [vmem:[#allocation8 + $0x4] sm:$0xf] }
  0x6a   :  { %884 = vmatpush.bf16.msra.mxu3 %v1504_v10  ;;  %v1572_v10 = vor.u32 %v1708_v7, %v1571_v6  ;;  %v1613_v6 = vld [vmem:[#allocation8 + $0x98] sm:$0xf0] }
  0x6b   :  { %843 = vmatpush.bf16.msra.mxu0 %v1428_v1  ;;  %v1728_v1 = vld [vmem:[#allocation8 + $0xe4] sm:$0xf0] }
  0x6c   :  { %857 = vmatpush.bf16.msra.mxu1 %v1492_v19  ;;  %v1652_v3 = vor.u32 %v1728_v1, %v1651_v0  ;;  %v1648_v19 = vor.u32 %v1725_v16, %v1645_v18  ;;  %v1611_v0 = vld [vmem:[#allocation8 + $0x90] sm:$0xf]  ;;  %v1718_v1 = vld [vmem:[#allocation8 + $0x94] sm:$0xf0]  ;;  %v1603_v16 = vld [vmem:[#allocation8 + $0x80] sm:$0xf] }
  0x6d   :  { %871 = vmatpush.bf16.msra.mxu2 %v1432_v5  ;;  %v1656_v5 = vor.u32 %v1727_v2, %v1653_v4  ;;  %v418_v2 = vld [vmem:[#allocation7 + $0x2] sm:$0x3]  ;;  %v1612_v8 = vor.u32 %v1718_v1, %v1611_v0  ;;  %v1715_v18 = vld [vmem:[#allocation8 + $0x84] sm:$0xf] }
  0x6e   :  { %885 = vmatpush.bf16.msra.mxu3 %v1496_v21  ;;  %v1706_v21 = vld [vmem:[#allocation8 + $0x34] sm:$0xf0]  ;;  %v420_v11 = vperm.slane %v418_v2, 0 }
  0x6f   :  { %844 = vmatpush.bf16.msra.mxu0 %v1420_v14  ;;  %v1643_v14 = vld [vmem:[#allocation8 + $0xd0] sm:$0xf]  ;;  %v1564_v22 = vor.u32 %v1706_v21, %v1563_v20 }
  0x70   :  { %858 = vmatpush.bf16.msra.mxu1 %v1484_v57  ;;  %v1557_v57 = vld [vmem:[#allocation8 + $0x28] sm:$0xf0] }
  0x71   :  { %872 = vmatpush.bf16.msra.mxu2 %v1424_v15  ;;  %v1726_v15 = vld [vmem:[#allocation8 + $0xd4] sm:$0xf0] }
  0x72   :  { %886 = vmatpush.bf16.msra.mxu3 %v1488_v37  ;;  %v1644_v17 = vor.u32 %v1726_v15, %v1643_v14  ;;  %v1560_v37 = vor.u32 %v1703_v35, %v1557_v57 }
  0x73   :  { %845 = vmatpush.bf16.msra.mxu0 %v1412_v25  ;;  %v1568_v25 = vor.u32 %v1705_v23, %v1565_v24  ;;  %v421_v24 = vperm.slane %v418_v2, 1 }
  0x74   :  { %859 = vmatpush.bf16.msra.mxu1 %v1476_v48 }
  0x75   :  { %873 = vmatpush.bf16.msra.mxu2 %v1416_v29  ;;  %v1636_v29 = vor.u32 %v1724_v27, %v1635_v26 }
  0x76   :  { %887 = vmatpush.bf16.msra.mxu3 %v1480_v49  ;;  %v1701_v49 = vld [vmem:[#allocation8 + $0x14] sm:$0xf] }
  0x77   :  { %1054 = vmatpush.bf16.msrb.mxu0 %v1596_v30  ;;  %v1637_v30 = vld [vmem:[#allocation8 + $0xc8] sm:$0xf0]  ;;  %v1552_v52 = vor.u32 %v1701_v49, %v1549_v50 }
  0x78   :  { %1068 = vmatpush.bf16.msrb.mxu1 %v1660_v53  ;;  %v1640_v32 = vor.u32 %v1723_v28, %v1637_v30  ;;  %v1720_v53 = vld [vmem:[#allocation8 + $0xa4] sm:$0xf0] }
  0x79   :  { %1082 = vmatpush.bf16.msrb.mxu2 %v1600_v34  ;;  %v1704_v34 = vld [vmem:[#allocation8 + $0x24] sm:$0xf0] }
  0x7a   :  { %1096 = vmatpush.bf16.msrb.mxu3 %v1664_v58  ;;  %v1556_v54 = vor.u32 %v1704_v34, %v1555_v33  ;;  %v1620_v58 = vor.u32 %v1720_v53, %v1619_v51 }
  0x7b   :  { %1055 = vmatpush.bf16.msrb.mxu0 %v1588_v40  ;;  %v1721_v40 = vld [vmem:[#allocation8 + $0xb4] sm:$0xf] }
  0x7c   :  { %1069 = vmatpush.bf16.msrb.mxu1 %v1652_v3  ;;  %v1632_v47 = vor.u32 %v1721_v40, %v1629_v43  ;;  %v1540_v3 = vor.u32 %v1700_v60, %v1539_v59 }
  0x7d   :  { %1083 = vmatpush.bf16.msrb.mxu2 %v1592_v44  ;;  %v1547_v44 = vld [vmem:[#allocation8 + $0x10] sm:$0xf] }
  0x7e   :  { %1097 = vmatpush.bf16.msrb.mxu3 %v1656_v5  ;;  %v1548_v48 = vor.u32 %v1702_v45, %v1547_v44  ;;  %v1717_v5 = vld [vmem:[#allocation8 + $0x94] sm:$0xf] }
  0x7f   :  { %1056 = vmatpush.bf16.msrb.mxu0 %v1580_v62  ;;  %v1624_v62 = vor.u32 %v1719_v55, %v1621_v56  ;;  %v1616_v14 = vor.u32 %v1717_v5, %v1613_v6 }
  0x80   :  { %1070 = vmatpush.bf16.msrb.mxu1 %v1644_v17  ;;  %v1716_v17 = vld [vmem:[#allocation8 + $0x84] sm:$0xf0] }
  0x81   :  { %1084 = vmatpush.bf16.msrb.mxu2 %v1584_v63  ;;  %v1541_v63 = vld [vmem:[#allocation8 + $0x8] sm:$0xf0]  ;;  %v1604_v20 = vor.u32 %v1716_v17, %v1603_v16 }
  0x82   :  { %1098 = vmatpush.bf16.msrb.mxu3 %v1648_v19  ;;  %v1544_v4 = vor.u32 %v1699_v61, %v1541_v63  ;;  %v1605_v19 = vld [vmem:[#allocation8 + $0x88] sm:$0xf0] }
  0x83   :  { %1057 = vmatpush.bf16.msrb.mxu0 %v1572_v10  ;;  %v1608_v21 = vor.u32 %v1715_v18, %v1605_v19 }
  0x84   :  { %1071 = vmatpush.bf16.msrb.mxu1 %v1636_v29 }
  0x85   :  { %1085 = vmatpush.bf16.msrb.mxu2 %v1576_v13 }
  0x86   :  { %1099 = vmatpush.bf16.msrb.mxu3 %v1640_v32  ;;  %v116_v32 = vld [vmem:[#allocation7] sm:$0x3] }
  0x87   :  { %1058 = vmatpush.bf16.msrb.mxu0 %v1564_v22 }
  0x88   :  { %1072 = vmatpush.bf16.msrb.mxu1 %v1628_v42 }
  0x89   :  { %1086 = vmatpush.bf16.msrb.mxu2 %v1568_v25 }
  0x8a   :  { %1100 = vmatpush.bf16.msrb.mxu3 %v1632_v47 }
  0x8b   :  { %1059 = vmatpush.bf16.msrb.mxu0 %v1556_v54  ;;  %v118_v54 = vperm.slane %v116_v32, 0 }
  0x8c   :  { %1073 = vmatpush.bf16.msrb.mxu1 %v1620_v58 }
  0x8d   :  { %1087 = vmatpush.bf16.msrb.mxu2 %v1560_v37 }
  0x8e   :  { %1101 = vmatpush.bf16.msrb.mxu3 %v1624_v62 }
  0x8f   :  { %1060 = vmatpush.bf16.msrb.mxu0 %v1548_v48  ;;  %v119_v48 = vperm.slane %v116_v32, 1 }
  0x90   :  { %1074 = vmatpush.bf16.msrb.mxu1 %v1612_v8 }
  0x91   :  { %1088 = vmatpush.bf16.msrb.mxu2 %v1552_v52 }
  0x92   :  { %1102 = vmatpush.bf16.msrb.mxu3 %v1616_v14 }
  0x93   :  { %1061 = vmatpush.bf16.msrb.mxu0 %v1540_v3 }
  0x94   :  { %1075 = vmatpush.bf16.msrb.mxu1 %v1604_v20 }
  0x95   :  { %1089 = vmatpush.bf16.msrb.mxu2 %v1544_v4 }
  0x96   :  { %1103 = vmatpush.bf16.msrb.mxu3 %v1608_v21 }
  0xb3   :  { %v1998_v9 = vpop.f32.mrf.mxu0 }
  0xb4   :  { %v2000_v12 = vpop.f32.mrf.mxu1  ;;  %v302_v43 = vadd.f32 %v1998_v9, %v118_v54 }
  0xb6   :  { %v316_v50 = vadd.f32 %v2000_v12, %v302_v43 }
  0xb8   :  { %v348_v55 = vmax.f32 %v316_v50, 0.0 }
  0xbb   :  { %v2002_v31 = vpop.f32.mrf.mxu2  ;;  %v2006_v41 = vpop.f32.mrf.mxu0 }
  0xbc   :  { %v2004_v36 = vpop.f32.mrf.mxu3  ;;  %v2008_v46 = vpop.f32.mrf.mxu1  ;;  %v304_v44 = vadd.f32 %v2006_v41, %v118_v54  ;;  %v330_v52 = vadd.f32 %v2002_v31, %v119_v48 }
  0xbe   :  { %v318_v51 = vadd.f32 %v2008_v46, %v304_v44  ;;  %v344_v58 = vadd.f32 %v2004_v36, %v330_v52  ;;  %v1110_v36 = vld [vmem:[%s2029_s4] sm:$0x3]  ;;  %s1940_s4 = smov [#allocation10]  }
  0xbf   :  { %v1112_v6 = vperm.slane %v1110_v36, 0  ;;  %v1113_v17 = vperm.slane %v1110_v36, 1  ;;  %s1128_s15 = sshll.u32 %s1940_s4, 4  ;;  %s1129_s15 = int_to_ptr.vmem [resolvable:$true] %s1128_s15 }
  0xc0   :  { %v350_v56 = vmax.f32 %v318_v51, 0.0  ;;  %v349_v41 = vmax.f32 %v344_v58, 0.0 }
  0xc2   :  { %v352_v59 = vpack.c.bf16 %v350_v56, %v348_v55 }
  0xc3   :  { %v331_v7 = vpop.f32.mrf.mxu2 }
  0xc4   :  { %v345_v10 = vpop.f32.mrf.mxu3  ;;  %v332_v53 = vadd.f32 %v331_v7, %v119_v48 }
  0xc6   :  { %v346_v9 = vadd.f32 %v345_v10, %v332_v53 }
  0xc8   :  { %v351_v60 = vmax.f32 %v346_v9, 0.0 }
  0xca   :  { %v353_v61 = vpack.c.bf16 %v351_v60, %v349_v41 }
  0xd3   :  { %v593_v13 = vpop.f32.mrf.mxu0 }
  0xd4   :  { %v607_v15 = vpop.f32.mrf.mxu1  ;;  %v594_v22 = vadd.f32 %v593_v13, %v420_v11 }
  0xd6   :  { %v608_v27 = vadd.f32 %v607_v15, %v594_v22 }
  0xd8   :  { %v640_v34 = vmax.f32 %v608_v27, 0.0 }
  0xdb   :  { %v621_v23 = vpop.f32.mrf.mxu2  ;;  %v595_v26 = vpop.f32.mrf.mxu0 }
  0xdc   :  { %v635_v25 = vpop.f32.mrf.mxu3  ;;  %v596_v28 = vadd.f32 %v595_v26, %v420_v11  ;;  %v609_v29 = vpop.f32.mrf.mxu1  ;;  %v622_v33 = vadd.f32 %v621_v23, %v421_v24 }
  0xde   :  { %v610_v30 = vadd.f32 %v609_v29, %v596_v28  ;;  %v636_v38 = vadd.f32 %v635_v25, %v622_v33 }
  0xe0   :  { %v642_v35 = vmax.f32 %v610_v30, 0.0  ;;  %v641_v45 = vmax.f32 %v636_v38, 0.0 }
  0xe2   :  { %v644_v57 = vpack.c.bf16 %v642_v35, %v640_v34 }
  0xe3   :  { %v623_v37 = vpop.f32.mrf.mxu2 }
  0xe4   :  { %v624_v39 = vadd.f32 %v623_v37, %v421_v24  ;;  %v637_v40 = vpop.f32.mrf.mxu3  ;;  %846 = vmatmul.bf16.vlgmr.msra.gmra.mxu0 %v644_v57  ;;  %874 = vmatmul.bf16.vlgmr.msra.gmra.mxu2 %v644_v57 }
  0xe6   :  { %v638_v42 = vadd.f32 %v637_v40, %v624_v39 }
  0xe8   :  { %v643_v47 = vmax.f32 %v638_v42, 0.0 }
  0xea   :  { %v645_v49 = vpack.c.bf16 %v643_v47, %v641_v45 }
  0xec   :  { %860 = vmatmul.bf16.vlgmr.msra.gmra.mxu1 %v645_v49  ;;  %888 = vmatmul.bf16.vlgmr.msra.gmra.mxu3 %v645_v49 }
  0xf4   :  { %1062 = vmatmul.bf16.vlgmr.msrb.gmra.mxu0 %v352_v59  ;;  %1090 = vmatmul.bf16.vlgmr.msrb.gmra.mxu2 %v352_v59 }
  0xfc   :  { %1076 = vmatmul.bf16.vlgmr.msrb.gmra.mxu1 %v353_v61  ;;  %1104 = vmatmul.bf16.vlgmr.msrb.gmra.mxu3 %v353_v61 }
 0x161   :  { %v847_v12 = vpop.f32.mrf.mxu0 }
 0x167   :  { %v875_v46 = vpop.f32.mrf.mxu2 }
 0x169   :  { %v861_v62 = vpop.f32.mrf.mxu1  ;;  %v849_v63 = vpop.f32.mrf.mxu0 }
 0x16a   :  { %v862_v3 = vadd.f32 %v861_v62, %v847_v12 }
 0x16f   :  { %v889_v0 = vpop.f32.mrf.mxu3  ;;  %v877_v31 = vpop.f32.mrf.mxu2 }
 0x170   :  { %v890_v11 = vadd.f32 %v889_v0, %v875_v46 }
 0x171   :  { %v863_v1 = vpop.f32.mrf.mxu1  ;;  %v1063_v2 = vpop.f32.mrf.mxu0 }
 0x172   :  { %v1064_v5 = vadd.f32 %v1063_v2, %v862_v3  ;;  %v864_v15 = vadd.f32 %v863_v1, %v849_v63 }
 0x177   :  { %v891_v4 = vpop.f32.mrf.mxu3  ;;  %v1091_v8 = vpop.f32.mrf.mxu2 }
 0x178   :  { %v1092_v16 = vadd.f32 %v1091_v8, %v890_v11  ;;  %v892_v25 = vadd.f32 %v891_v4, %v877_v31 }
 0x179   :  { %v1077_v7 = vpop.f32.mrf.mxu1  ;;  %v1065_v14 = vpop.f32.mrf.mxu0 }
 0x17a   :  { %v1078_v10 = vadd.f32 %v1077_v7, %v1064_v5  ;;  %v1066_v19 = vadd.f32 %v1065_v14, %v864_v15 }
 0x17c   :  { %v1116_v13 = vadd.f32 %v1112_v6, %v1078_v10 }
 0x17e   :  { %1120 = vst [vmem:[#allocation10] sm:$0xff] %v1116_v13 }
 0x17f   :  { %v1105_v18 = vpop.f32.mrf.mxu3  ;;  %v1093_v24 = vpop.f32.mrf.mxu2 }
 0x180   :  { %v1106_v20 = vadd.f32 %v1105_v18, %v1092_v16  ;;  %v1094_v27 = vadd.f32 %v1093_v24, %v892_v25 }
 0x181   :  { %v1079_v21 = vpop.f32.mrf.mxu1 }
 0x182   :  { %v1117_v22 = vadd.f32 %v1113_v17, %v1106_v20  ;;  %v1080_v23 = vadd.f32 %v1079_v21, %v1066_v19 }
 0x184   :  { %1121 = vst [vmem:[#allocation10 + $0x8] sm:$0xff] %v1117_v22  ;;  %v1118_v26 = vadd.f32 %v1112_v6, %v1080_v23 }
 0x186   :  { %1122 = vst [vmem:[#allocation10 + $0x10] sm:$0xff] %v1118_v26 }
 0x187   :  { %v1107_v28 = vpop.f32.mrf.mxu3 }
 0x188   :  { %v1108_v29 = vadd.f32 %v1107_v28, %v1094_v27 }
 0x18a   :  { %v1119_v30 = vadd.f32 %v1113_v17, %v1108_v29 }
 0x18c   :  { %1123 = vst [vmem:[#allocation10 + $0x18] sm:$0xff] %v1119_v30 }
 0x18d   :  { %1136 = dma.vmem_to_hbm [thread:$0]  %s1129_s15, 512, %s1131_s18, [#allocation4], %s1933_s26, %s1933_s26, %s1934_s27  }
 0x18e   :  { %1930 = dma.done.wait [#allocation4], 512  }
 0x18f   :  { %1931 = vsyncadd [#allocation4], 4294966784 }
 0x190   :  { %1141 = vsyncpa [#allocation3], 1 }
 0x191   :  { %1142 = vsyncpa [#allocation6], 1 }
 0x192   :  { %1143 = vsyncpa [#allocation9], 1 }
 0x193   :  { %1144 = vsyncpa [#allocation4], 1 }

</bundles_post_ra>
